<compile_context>
chip_gen: v5e
topology: v5e:2x2
jax: 0.10.0
libtpu: 0.0.40
codegen_flags: <defaults>
</compile_context>

<pallas_src>
import math
from functools import partial

import jax
import jax.numpy as jnp
from jax.experimental import pallas as pl
from jax.experimental.pallas import tpu as pltpu

S_DIM, K_DIM = 64, 32          # assumed split of the 96-wide concatenated input
D_IN = S_DIM + K_DIM           # 96  (input_layer fan-in)
D_H = 32                       # hidden width
D_OUT = 2                      # classes


def _ensemble_kernel(s_ref, k_ref, w0s_ref, w0k_ref, b0_ref, wd_ref, bd_ref,
                     out_ref):
    # hidden = relu(cat(s, k) @ W0 + b0); concat fused by splitting W0 along
    # its input axis.  Inputs arrive f32 and are cast to bf16 in-register
    # (free VPU work under the DMA); MXU accumulates in f32.
    h = jnp.dot(s_ref[...].astype(jnp.bfloat16), w0s_ref[...],
                preferred_element_type=jnp.float32)
    h = h + jnp.dot(k_ref[...].astype(jnp.bfloat16), w0k_ref[...],
                    preferred_element_type=jnp.float32)
    h = jnp.maximum(h + b0_ref[...], 0.0)                        # (TB, 32) f32

    # 2-class softmax == sigmoid of the logit difference (diff folded outside).
    d = jnp.sum(h * wd_ref[...], axis=-1, keepdims=True) + bd_ref[...]  # (TB,1)
    p1 = 1.0 / (1.0 + jnp.exp(-d))                               # EUP exp
    p0 = 1.0 / (1.0 + jnp.exp(d))                                # sigmoid(-d)

    # Narrow (TB, 2) store: class-0 prob in lane 0, class-1 prob in lane 1.
    lane = jax.lax.broadcasted_iota(jnp.int32, out_ref.shape, 1)
    out_ref[...] = jnp.where(lane == 0, p0, p1)


def _default_tile_b(B):
    # Big tiles (up to 2048 rows) for HBM-roofline efficiency, but prefer
    # >= 4 grid steps (2 pipelined iterations per TC on v7x megacore),
    # falling back to >= 2 steps, then a single full-array block.
    candidates = (2048, 1024, 512, 256, 128, 64, 32, 16, 8)
    for min_steps in (4, 2):
        for t in candidates:
            if B % t == 0 and B // t >= min_steps:
                return t
    return B


@partial(jax.jit, static_argnames=("tile_b",))
def ensemble_forward(s_input, k_input, params, *, tile_b=None):
    B = s_input.shape[0]
    assert s_input.shape == (B, S_DIM) and k_input.shape == (B, K_DIM)
    if tile_b is None:
        tile_b = _default_tile_b(B)
    assert B % tile_b == 0
    if tile_b != B:
        assert tile_b % 8 == 0, "row tiles must be a multiple of 8"

    (w0, b0), (w1, b1) = params
    # bf16 storage for the (only sizeable) first-layer weights (~12 KiB total).
    w0s = w0[:S_DIM].astype(jnp.bfloat16)                        # (64, 32)
    w0k = w0[S_DIM:].astype(jnp.bfloat16)                        # (32, 32)
    b0f = jnp.reshape(b0, (1, D_H)).astype(jnp.float32)          # (1, 32)
    # Fold the output layer into a logit-difference vector/bias (kept f32).
    b1f = jnp.reshape(b1, (-1,)).astype(jnp.float32)             # (2,)
    wd = (w1[:, 1] - w1[:, 0]).reshape(1, D_H).astype(jnp.float32)   # (1, 32)
    bd = (b1f[1] - b1f[0]).reshape(1, 1)                         # (1, 1)

    def full(shape):
        return pl.BlockSpec(shape, lambda i: (0,) * len(shape))

    grid = (B // tile_b,)
    return pl.pallas_call(
        _ensemble_kernel,
        out_shape=jax.ShapeDtypeStruct((B, D_OUT), jnp.float32),
        grid_spec=pltpu.PrefetchScalarGridSpec(
            num_scalar_prefetch=0,
            grid=grid,
            in_specs=[
                pl.BlockSpec((tile_b, S_DIM), lambda i: (i, 0)),
                pl.BlockSpec((tile_b, K_DIM), lambda i: (i, 0)),
                full((S_DIM, D_H)), full((K_DIM, D_H)), full((1, D_H)),
                full((1, D_H)), full((1, 1)),
            ],
            out_specs=pl.BlockSpec((tile_b, D_OUT), lambda i: (i, 0)),
        ),
        compiler_params=pltpu.CompilerParams(
            dimension_semantics=("parallel",),
            vmem_limit_bytes=32 * 1024 * 1024,
        ),
    )(s_input, k_input, w0s, w0k, b0f, wd, bd)


def init_params(key):
    """PyTorch nn.Linear-style uniform(-1/sqrt(fan_in), +1/sqrt(fan_in)) init.

    Weights are stored (in_features, out_features); torch's state_dict stores
    the transpose -- transpose when importing real weights.
    """
    key, kw0, kb0, kw1, kb1 = jax.random.split(key, 5)
    bound0 = 1.0 / math.sqrt(D_IN)
    w0 = jax.random.uniform(kw0, (D_IN, D_H), jnp.float32, -bound0, bound0)
    b0 = jax.random.uniform(kb0, (D_H,), jnp.float32, -bound0, bound0)
    bound1 = 1.0 / math.sqrt(D_H)
    w1 = jax.random.uniform(kw1, (D_H, D_OUT), jnp.float32, -bound1, bound1)
    b1 = jax.random.uniform(kb1, (D_OUT,), jnp.float32, -bound1, bound1)
    return (w0, b0), (w1, b1)


def reference_forward(s_input, k_input, params):
    """Pure-JAX reference of the torch forward (bf16 rounding mirrored, f32 math)."""
    (w0, b0), (w1, b1) = params
    x = jnp.concatenate([s_input, k_input], axis=1)
    x = x.astype(jnp.bfloat16).astype(jnp.float32)
    w0f = w0.astype(jnp.bfloat16).astype(jnp.float32)
    h = jax.nn.relu(jnp.dot(x, w0f, precision=jax.lax.Precision.HIGHEST)
                    + jnp.reshape(b0, (1, D_H)))
    logits = (jnp.dot(h, w1, precision=jax.lax.Precision.HIGHEST)
              + jnp.reshape(b1, (1, D_OUT)))
    return jax.nn.softmax(logits, axis=1)


if __name__ == "__main__":
    key = jax.random.PRNGKey(0)
    key, ks, kk = jax.random.split(key, 3)
    B = 64                                   # tile_b defaults to 16 -> grid of 4
    s = jax.random.normal(ks, (B, S_DIM), jnp.float32)
    k = jax.random.normal(kk, (B, K_DIM), jnp.float32)
    params = init_params(key)

    out = ensemble_forward(s, k, params)
    out = jax.block_until_ready(out)

    ref = reference_forward(s, k, params)
    assert out.shape == (B, D_OUT)
    assert jnp.allclose(out, ref, atol=2e-5, rtol=1e-5)
    assert jnp.allclose(jnp.sum(out, axis=1), 1.0, atol=1e-5)

    print("KERNEL_OK")
</pallas_src>

<mosaic_0001>
module attributes {stable_mosaic.version = 11 : i64} {
  func.func @_ensemble_kernel(%arg0: i32, %arg1: memref<16x64xf32, #tpu.memory_space<vmem>>, %arg2: memref<16x32xf32, #tpu.memory_space<vmem>>, %arg3: memref<64x32xbf16, #tpu.memory_space<vmem>>, %arg4: memref<32x32xbf16, #tpu.memory_space<vmem>>, %arg5: memref<1x32xf32, #tpu.memory_space<vmem>>, %arg6: memref<1x32xf32, #tpu.memory_space<vmem>>, %arg7: memref<1x1xf32, #tpu.memory_space<vmem>>, %arg8: memref<16x2xf32, #tpu.memory_space<vmem>>) attributes {dimension_semantics = [#tpu.dimension_semantics<parallel>], iteration_bounds = array<i64: 4>, scalar_prefetch = 0 : i64, scratch_operands = 0 : i64, tpu.core_type = #tpu.core_type<tc>, window_params = [{transform_indices = @transform_0, window_bounds = array<i64: 16, 64>}, {transform_indices = @transform_1, window_bounds = array<i64: 16, 32>}, {pipeline_mode = #tpu.pipeline_mode<synchronous>, transform_indices = @transform_2, window_bounds = array<i64: 64, 32>}, {pipeline_mode = #tpu.pipeline_mode<synchronous>, transform_indices = @transform_3, window_bounds = array<i64: 32, 32>}, {pipeline_mode = #tpu.pipeline_mode<synchronous>, transform_indices = @transform_4, window_bounds = array<i64: 1, 32>}, {pipeline_mode = #tpu.pipeline_mode<synchronous>, transform_indices = @transform_5, window_bounds = array<i64: 1, 32>}, {pipeline_mode = #tpu.pipeline_mode<synchronous>, transform_indices = @transform_6, window_bounds = array<i64: 1, 1>}, {transform_indices = @transform_7, window_bounds = array<i64: 16, 2>}]} {
    %c0 = arith.constant 0 : index
    %c0_0 = arith.constant 0 : index
    %0 = vector.load %arg1[%c0, %c0_0] : memref<16x64xf32, #tpu.memory_space<vmem>>, vector<16x64xf32>
    %1 = arith.truncf %0 : vector<16x64xf32> to vector<16x64xbf16>
    %c0_1 = arith.constant 0 : index
    %c0_2 = arith.constant 0 : index
    %2 = vector.load %arg3[%c0_1, %c0_2] : memref<64x32xbf16, #tpu.memory_space<vmem>>, vector<64x32xbf16>
    %cst = arith.constant dense<0.000000e+00> : vector<16x32xf32>
    %3 = tpu.matmul %1, %2, %cst {dimension_numbers = #tpu.dot_dimension_numbers<[1], [0], [0], [1], [0, 0, 1, 1], [], []>} : vector<16x64xbf16>, vector<64x32xbf16>, vector<16x32xf32> -> vector<16x32xf32>
    %c0_3 = arith.constant 0 : index
    %c0_4 = arith.constant 0 : index
    %4 = vector.load %arg2[%c0_3, %c0_4] : memref<16x32xf32, #tpu.memory_space<vmem>>, vector<16x32xf32>
    %5 = arith.truncf %4 : vector<16x32xf32> to vector<16x32xbf16>
    %c0_5 = arith.constant 0 : index
    %c0_6 = arith.constant 0 : index
    %6 = vector.load %arg4[%c0_5, %c0_6] : memref<32x32xbf16, #tpu.memory_space<vmem>>, vector<32x32xbf16>
    %cst_7 = arith.constant dense<0.000000e+00> : vector<16x32xf32>
    %7 = tpu.matmul %5, %6, %cst_7 {dimension_numbers = #tpu.dot_dimension_numbers<[1], [0], [0], [1], [0, 0, 1, 1], [], []>} : vector<16x32xbf16>, vector<32x32xbf16>, vector<16x32xf32> -> vector<16x32xf32>
    %8 = arith.addf %3, %7 : vector<16x32xf32>
    %c0_8 = arith.constant 0 : index
    %c0_9 = arith.constant 0 : index
    %9 = vector.load %arg5[%c0_8, %c0_9] : memref<1x32xf32, #tpu.memory_space<vmem>>, vector<1x32xf32>
    %10 = vector.broadcast %9 : vector<1x32xf32> to vector<16x32xf32>
    %11 = arith.addf %8, %10 : vector<16x32xf32>
    %cst_10 = arith.constant 0.000000e+00 : f32
    %12 = vector.broadcast %cst_10 : f32 to vector<16x32xf32>
    %13 = arith.maximumf %11, %12 : vector<16x32xf32>
    %c0_11 = arith.constant 0 : index
    %c0_12 = arith.constant 0 : index
    %14 = vector.load %arg6[%c0_11, %c0_12] : memref<1x32xf32, #tpu.memory_space<vmem>>, vector<1x32xf32>
    %15 = vector.broadcast %14 : vector<1x32xf32> to vector<16x32xf32>
    %16 = arith.mulf %13, %15 : vector<16x32xf32>
    %cst_13 = arith.constant dense<0.000000e+00> : vector<16xf32>
    %17 = vector.multi_reduction <add>, %16, %cst_13 [1] : vector<16x32xf32> to vector<16xf32>
    %18 = vector.shape_cast %17 : vector<16xf32> to vector<16x1xf32>
    %c0_14 = arith.constant 0 : index
    %c0_15 = arith.constant 0 : index
    %19 = vector.load %arg7[%c0_14, %c0_15] : memref<1x1xf32, #tpu.memory_space<vmem>>, vector<1x1xf32>
    %20 = vector.broadcast %19 : vector<1x1xf32> to vector<16x1xf32>
    %21 = arith.addf %18, %20 : vector<16x1xf32>
    %cst_16 = arith.constant 0.000000e+00 : f32
    %22 = vector.broadcast %cst_16 : f32 to vector<16x1xf32>
    %23 = arith.subf %22, %21 : vector<16x1xf32>
    %24 = math.exp %23 : vector<16x1xf32>
    %cst_17 = arith.constant 1.000000e+00 : f32
    %25 = vector.broadcast %cst_17 : f32 to vector<16x1xf32>
    %26 = arith.addf %25, %24 : vector<16x1xf32>
    %cst_18 = arith.constant 1.000000e+00 : f32
    %27 = vector.broadcast %cst_18 : f32 to vector<16x1xf32>
    %28 = arith.divf %27, %26 : vector<16x1xf32>
    %29 = math.exp %21 : vector<16x1xf32>
    %cst_19 = arith.constant 1.000000e+00 : f32
    %30 = vector.broadcast %cst_19 : f32 to vector<16x1xf32>
    %31 = arith.addf %30, %29 : vector<16x1xf32>
    %cst_20 = arith.constant 1.000000e+00 : f32
    %32 = vector.broadcast %cst_20 : f32 to vector<16x1xf32>
    %33 = arith.divf %32, %31 : vector<16x1xf32>
    %34 = tpu.iota {dimensions = array<i32: 1>} : vector<16x2xi32>
    %c0_i32 = arith.constant 0 : i32
    %35 = vector.broadcast %c0_i32 : i32 to vector<16x2xi32>
    %36 = arith.cmpi eq, %34, %35 : vector<16x2xi32>
    %37 = vector.shape_cast %33 : vector<16x1xf32> to vector<16x1xf32>
    %38 = vector.broadcast %37 : vector<16x1xf32> to vector<16x2xf32>
    %39 = vector.shape_cast %28 : vector<16x1xf32> to vector<16x1xf32>
    %40 = vector.broadcast %39 : vector<16x1xf32> to vector<16x2xf32>
    %41 = arith.select %36, %38, %40 : vector<16x2xi1>, vector<16x2xf32>
    %c0_21 = arith.constant 0 : index
    %c0_22 = arith.constant 0 : index
    %42 = vector.load %arg8[%c0_21, %c0_22] : memref<16x2xf32, #tpu.memory_space<vmem>>, vector<16x2xf32>
    tpu.vector_store %arg8[%c0_21, %c0_22], %41 {strides = array<i32>} : memref<16x2xf32, #tpu.memory_space<vmem>>, vector<16x2xf32>,
    return
  }
  func.func @transform_0(%arg0: i32) -> (i32, i32) {
    %c0_i32 = arith.constant 0 : i32
    %c0_i32_0 = arith.constant 0 : i32
    return %arg0, %c0_i32 : i32, i32
  }
  func.func @transform_1(%arg0: i32) -> (i32, i32) {
    %c0_i32 = arith.constant 0 : i32
    %c0_i32_0 = arith.constant 0 : i32
    return %arg0, %c0_i32 : i32, i32
  }
  func.func @transform_2(%arg0: i32) -> (i32, i32) {
    %c0_i32 = arith.constant 0 : i32
    %c0_i32_0 = arith.constant 0 : i32
    %c0_i32_1 = arith.constant 0 : i32
    return %c0_i32, %c0_i32_0 : i32, i32
  }
  func.func @transform_3(%arg0: i32) -> (i32, i32) {
    %c0_i32 = arith.constant 0 : i32
    %c0_i32_0 = arith.constant 0 : i32
    %c0_i32_1 = arith.constant 0 : i32
    return %c0_i32, %c0_i32_0 : i32, i32
  }
  func.func @transform_4(%arg0: i32) -> (i32, i32) {
    %c0_i32 = arith.constant 0 : i32
    %c0_i32_0 = arith.constant 0 : i32
    %c0_i32_1 = arith.constant 0 : i32
    return %c0_i32, %c0_i32_0 : i32, i32
  }
  func.func @transform_5(%arg0: i32) -> (i32, i32) {
    %c0_i32 = arith.constant 0 : i32
    %c0_i32_0 = arith.constant 0 : i32
    %c0_i32_1 = arith.constant 0 : i32
    return %c0_i32, %c0_i32_0 : i32, i32
  }
  func.func @transform_6(%arg0: i32) -> (i32, i32) {
    %c0_i32 = arith.constant 0 : i32
    %c0_i32_0 = arith.constant 0 : i32
    %c0_i32_1 = arith.constant 0 : i32
    return %c0_i32, %c0_i32_0 : i32, i32
  }
  func.func @transform_7(%arg0: i32) -> (i32, i32) {
    %c0_i32 = arith.constant 0 : i32
    %c0_i32_0 = arith.constant 0 : i32
    return %arg0, %c0_i32 : i32, i32
  }
}

</mosaic_0001>

<bundles_post_ra>
// kernel: ensemble_forward.1
= control target key start
LH: loop header
LB: loop body
LE: loop exit
PB: predicated region body
PF: predicated region fallthrough
CT: control target
= control target key end

     0   :  { %s721_s26 = smov 0   ;;  %s773_s0 = inlined_call_operand.vmem [shape: f32[64,64], index: 0, kind: input, shape index: {}]   ;;  %s774_s1 = inlined_call_operand.vmem [shape: f32[64,32], index: 1, kind: input, shape index: {}]   ;;  %s775_s2 = inlined_call_operand.vmem [shape: bf16[64,32], index: 2, kind: input, shape index: {}]   ;;  %s776_s3 = inlined_call_operand.vmem [shape: bf16[32,32], index: 3, kind: input, shape index: {}]   ;;  %s777_s4 = inlined_call_operand.vmem [shape: f32[1,32], index: 4, kind: input, shape index: {}]   ;;  %s778_s5 = inlined_call_operand.vmem [shape: f32[1,32], index: 5, kind: input, shape index: {}]   ;;  %s779_s6 = inlined_call_operand.<no memory space> [shape: f32[1,1], index: 6, kind: input, shape index: {}]   ;;  %s780_s7 = inlined_call_operand.vmem [shape: f32[64,2], index: 7, kind: output, shape index: {}]  }
   0x1   :  { %v12_v0 = vstv %s779_s6 }
   0x2   :  { %13 = vst [vmem:[#allocation2] sm:$0x1] %v12_v0 }
   0x3 LB: > { %s593_s27 = sadd.s32 4294967295, %s675_s26   ;;  %p597_p0 = scmp.ge.s32.totalorder %s675_s26, 1  ;;  %s675_s26 = sphi %s721_s26, %s19_s26  }
   0x4   : > { %p251_p1 = scmp.lt.s32.totalorder %s675_s26, 5 }
   0x6   : > { %p252_p2 = pnand %p597_p0, %p251_p1 }
   0x7   : > { %s598_s8 = sshll.u32 (!%p252_p2), %s593_s27, 1 }
   0x8   : > { %255 = sbr.rel (%p252_p2) target bundleno = 435 (0x1b3), region = 48  ;;  %p289_p3 = scmp.lt.s32.totalorder (!%p252_p2), %s598_s8, 7 }
   0xd   : > { %v637_v1 = vld [vmem:[%s776_s3 + $0x8] sm:$0xff]  ;;  %v635_v2 = vld [vmem:[%s775_s2 + $0x18] sm:$0xff]  ;;  %v636_v3 = vld [vmem:[%s776_s3] sm:$0xff]  ;;  %s782_s8 = smov (!%p289_p3, %s598_s8), 7  ;;  %vm337_vm0 = vcmask 261120   ;;  %vm379_vm1 = vcmask 523264  }
   0xe   : > { %v634_v4 = vld [vmem:[%s775_s2 + $0x10] sm:$0xff]  ;;  %347 = vmatpush.bf16.msra.mxu0 %v637_v1  ;;  %387 = vmatpush.bf16.msra.mxu1 %v635_v2  ;;  %s741_s13 = sshll.u32 %s782_s8, 3  ;;  %v633_v5 = vld [vmem:[%s775_s2 + $0x8] sm:$0xff]  ;;  %v632_v9 = vld [vmem:[%s775_s2] sm:$0xff]  ;;  %v677_v29 = vmov 0  }
   0xf   : > { %s298_s16 = scalar_lea.vmem %s774_s1, %s741_s13  ;;  %s292_s21 = scalar_lea.vmem %s773_s0, %s741_s13  ;;  %v650_v14 = vld [vmem:[%s777_s4] ss:$0 sm:$0xff]  ;;  %647 = vset.pattern.permute.xlu1 %v677_v29  ;;  %648 = vset.pattern.permute.xlu2 %v677_v29 }
  0x10   : > { %v318_v6 = vld [vmem:[%s298_s16] sm:$0xff]  ;;  %v319_v7 = vld [vmem:[%s298_s16 + $0x8] sm:$0xff]  ;;  %649 = vset.pattern.permute.xlu0 %v677_v29  ;;  %s304_s30 = scalar_lea.vmem %s780_s7, %s741_s13 }
  0x11   : > { %v320_v8 = vpack.c.bf16 %v319_v7, %v318_v6  ;;  %v307_v10 = vld [vmem:[%s292_s21] sm:$0xff]  ;;  %v308_v11 = vld [vmem:[%s292_s21 + $0x8] sm:$0xff] }
  0x12   : > { %348 = vmatpush.bf16.msra.mxu0 %v636_v3  ;;  %388 = vmatpush.bf16.msra.mxu1 %v634_v4  ;;  %v309_v12 = vpack.c.bf16 %v308_v11, %v307_v10  ;;  %v651_v18 = vld [vmem:[%s778_s5] ss:$0 sm:$0xff] }
  0x13   : > { %v652_v30 = vld [vmem:[#allocation2] ss:$0 sm:$0xff] }
  0x15   : > { %612 = vmatmul.msk.bf16.vlgmr.msra.gmra.mxu0 %vm337_vm0, %v320_v8 }
  0x16   : > { %389 = vmatpush.bf16.msra.mxu1 %v633_v5 }
  0x1a   : > { %390 = vmatpush.bf16.msra.mxu1 %v632_v9 }
  0x1d   : > { %629 = vmatmul.msk.bf16.vlgmr.msra.gmra.mxu1 %vm379_vm1, %v309_v12 }
  0x92   : > { %v350_v13 = vpop.f32.mrf.mxu0 }
  0x9a   : > { %v392_v15 = vpop.f32.mrf.mxu1  ;;  %v352_v21 = vpop.f32.mrf.mxu0 }
  0x9b   : > { %v393_v16 = vadd.f32 %v392_v15, %v350_v13 }
  0x9d   : > { %v401_v17 = vadd.f32 %v650_v14, %v393_v16 }
  0x9f   : > { %v403_v19 = vmax.f32 %v401_v17, 0.0 }
  0xa1   : > { %v409_v20 = vmul.f32 %v651_v18, %v403_v19 }
  0xa2   : > { %v394_v22 = vpop.f32.mrf.mxu1 }
  0xa3   : > { %v395_v23 = vadd.f32 %v394_v22, %v352_v21  ;;  %v411_v24 = vsel %vm337_vm0, %v409_v20, 0.0 }
  0xa4   : > { %412 = vadd.xlane.f32.xlu0 %v411_v24 }
  0xa5   : > { %v402_v25 = vadd.f32 %v650_v14, %v395_v23 }
  0xa7   : > { %v404_v26 = vmax.f32 %v402_v25, 0.0 }
  0xa9   : > { %v410_v27 = vmul.f32 %v651_v18, %v404_v26  ;;  %v497_v26 = vlaneseq }
  0xab   : > { %v414_v28 = vsel %vm337_vm0, %v410_v27, 0.0 }
  0xac   : > { %415 = vadd.xlane.f32.xlu0 %v414_v28  ;;  %v498_v28 = vand.u32 127, %v497_v26 }
 0x117   : > { %v413_v31 = vpop.xlane.xlu0 %412 }
 0x118   : > { %v421_v32 = vadd.f32 %v652_v30, %v413_v31 }
 0x11a   : > { %v423_v33 = vsub.f32 0.0, %v421_v32  ;;  %v461_v34 = vmul.f32 1.442695, %v421_v32 }
 0x11c   : > { %v425_v35 = vmul.f32 1.442695, %v423_v33  ;;  %653 = vpow2.f32 %v461_v34 }
 0x11e   : > { %655 = vpow2.f32 %v425_v35 }
 0x11f   : > { %v416_v36 = vpop.xlane.xlu0 %415 }
 0x120   : > { %v422_v37 = vadd.f32 %v652_v30, %v416_v36 }
 0x122   : > { %v654_v38 = vpop.eup %653  ;;  %v424_v39 = vsub.f32 0.0, %v422_v37  ;;  %v463_v40 = vmul.f32 1.442695, %v422_v37 }
 0x123   : > { %v465_v41 = vadd.f32 1.0, %v654_v38 }
 0x124   : > { %v656_v42 = vpop.eup %655  ;;  %v427_v43 = vmul.f32 1.442695, %v424_v39  ;;  %657 = vpow2.f32 %v463_v40 }
 0x125   : > { %v429_v44 = vadd.f32 1.0, %v656_v42  ;;  %659 = vrcp.f32 %v465_v41  ;;  %v478_v54 = vand.u32 2147483648, %v465_v41  ;;  %v476_v56 = vand.u32 2147483647, %v465_v41 }
 0x126   : > { %661 = vpow2.f32 %v427_v43  ;;  %vm472_vm3 = vweird.f32 %v465_v41 }
 0x127   : > { %663 = vrcp.f32 %v429_v44  ;;  %v479_v61 = vor.u32 1.1754944e-38, %v478_v54  ;;  %vm477_vm5 = vcmp.eq.f32.partialorder %v476_v56, 8.507059e+37  ;;  %vm436_vm7 = vweird.f32 %v429_v44 }
 0x128   : > { %v440_v5 = vand.u32 2147483647, %v429_v44  ;;  %v442_v6 = vand.u32 2147483648, %v429_v44 }
 0x12a   : > { %v658_v45 = vpop.eup %657  ;;  %v443_v14 = vor.u32 1.1754944e-38, %v442_v6  ;;  %vm441_vm12 = vcmp.eq.f32.partialorder %v440_v5, 8.507059e+37 }
 0x12b   : > { %v660_v46 = vpop.eup %659  ;;  %v466_v47 = vadd.f32 1.0, %v658_v45 }
 0x12c   : > { %v662_v48 = vpop.eup %661  ;;  %v468_v49 = vmul.f32 %v660_v46, %v465_v41  ;;  %vm473_vm2 = vweird.f32 %v660_v46 }
 0x12d   : > { %v664_v50 = vpop.eup %663  ;;  %v430_v51 = vadd.f32 1.0, %v662_v48  ;;  %665 = vrcp.f32 %v466_v47  ;;  %vm474_vm4 = vmor %vm472_vm3, %vm473_vm2  ;;  %v493_v7 = vand.u32 2147483648, %v466_v47  ;;  %v491_v9 = vand.u32 2147483647, %v466_v47 }
 0x12e   : > { %v469_v52 = vsub.f32 1.0, %v468_v49  ;;  %v432_v53 = vmul.f32 %v664_v50, %v429_v44  ;;  %vm437_vm6 = vweird.f32 %v664_v50  ;;  %vm487_vm10 = vweird.f32 %v466_v47 }
 0x12f   : > { %667 = vrcp.f32 %v430_v51  ;;  %vm438_vm9 = vmor %vm436_vm7, %vm437_vm6  ;;  %v494_v15 = vor.u32 1.1754944e-38, %v493_v7  ;;  %vm492_vm13 = vcmp.eq.f32.partialorder %v491_v9, 8.507059e+37  ;;  %v457_v20 = vand.u32 2147483648, %v430_v51 }
 0x130   : > { %v470_v55 = vmul.f32 %v660_v46, %v469_v52  ;;  %v433_v57 = vsub.f32 1.0, %v432_v53  ;;  %vm451_vm15 = vweird.f32 %v430_v51  ;;  %v455_v21 = vand.u32 2147483647, %v430_v51 }
 0x131   : > { %v458_v23 = vor.u32 1.1754944e-38, %v457_v20  ;;  %vm499_vm2 = vcmp.eq.s32.totalorder %v498_v28, 0  ;;  %vm522_vm3 = vcmask 15360  }
 0x132   : > { %v471_v58 = vadd.f32 %v660_v46, %v470_v55  ;;  %v434_v59 = vmul.f32 %v664_v50, %v433_v57  ;;  %vm456_vm1 = vcmp.eq.f32.partialorder %v455_v21, 8.507059e+37 }
 0x133   : > { %v666_v60 = vpop.eup %665 }
 0x134   : > { %v475_v62 = vsel %vm474_vm4, %v660_v46, %v471_v58  ;;  %v483_v63 = vmul.f32 %v666_v60, %v466_v47  ;;  %v435_v2 = vadd.f32 %v664_v50, %v434_v59  ;;  %vm488_vm8 = vweird.f32 %v666_v60 }
 0x135   : > { %v668_v0 = vpop.eup %667  ;;  %v480_v1 = vsel %vm477_vm5, %v479_v61, %v475_v62  ;;  %vm489_vm11 = vmor %vm487_vm10, %vm488_vm8 }
 0x136   : > { %502 = vperm.xlu1 %647, %v480_v1   ;;  %v484_v3 = vsub.f32 1.0, %v483_v63  ;;  %v447_v4 = vmul.f32 %v668_v0, %v430_v51  ;;  %v439_v11 = vsel %vm438_vm9, %v664_v50, %v435_v2  ;;  %vm452_vm14 = vweird.f32 %v668_v0 }
 0x137   : > { %v444_v17 = vsel %vm441_vm12, %v443_v14, %v439_v11  ;;  %vm453_vm0 = vmor %vm451_vm15, %vm452_vm14 }
 0x138   : > { %v485_v8 = vmul.f32 %v666_v60, %v484_v3  ;;  %v448_v10 = vsub.f32 1.0, %v447_v4 }
 0x13a   : > { %v486_v12 = vadd.f32 %v666_v60, %v485_v8  ;;  %v449_v13 = vmul.f32 %v668_v0, %v448_v10 }
 0x13c   : > { %v490_v16 = vsel %vm489_vm11, %v666_v60, %v486_v12  ;;  %v450_v19 = vadd.f32 %v668_v0, %v449_v13 }
 0x13d   : > { %v495_v18 = vsel %vm492_vm13, %v494_v15, %v490_v16 }
 0x13e   : > { %512 = vperm.xlu1 %647, %v444_v17   ;;  %507 = vperm.xlu2 %648, %v495_v18   ;;  %v454_v22 = vsel %vm453_vm0, %v668_v0, %v450_v19 }
 0x13f   : > { %v459_v24 = vsel %vm456_vm1, %v458_v23, %v454_v22 }
 0x146   : > { %517 = vperm.xlu2 %648, %v459_v24  }
 0x198   : > { %v508_v25 = vpop.permute.xlu2 %507 }
 0x1a0   : > { %v518_v29 = vpop.permute.xlu2 %517 }
 0x1a1   : > { %v521_v32 = vsel %vm499_vm2, %v508_v25, %v518_v29 }
 0x1a2   : > { %524 = vst.msk [vmem:[%s304_s30 + $0x8] sm:$0xff] %vm522_vm3, %v521_v32 }
 0x1a8   : > { %v503_v27 = vpop.permute.xlu1 %502 }
 0x1b0   : > { %v513_v30 = vpop.permute.xlu1 %512 }
 0x1b1   : > { %v520_v31 = vsel %vm499_vm2, %v503_v27, %v513_v30 }
 0x1b2   : > { %523 = vst.msk [vmem:[%s304_s30] sm:$0xff] %vm522_vm3, %v520_v31 }
 0x1b3 PF: > { %s19_s26 = sadd.s32 1, %s675_s26  }
 0x1b4   : > { %p16_p4 = scmp.ge.s32.totalorder %s19_s26, 6  }
 0x1b6   :  { %18 = sbr.rel (!%p16_p4) target bundleno = 3 (0x3), region = 81 }

</bundles_post_ra>
